<compile_context>
chip_gen: v5e
topology: v5e:2x2
jax: 0.10.0
libtpu: 0.0.40
codegen_flags: <defaults>
</compile_context>

<pallas_src>
import jax
import jax.numpy as jnp
from jax.experimental import pallas as pl
from jax.experimental.pallas import tpu as pltpu


def _round_up(x, m):
    return (x + m - 1) // m * m


# ----------------------------------------------------------------------------
# Fused Pallas kernel:  h = x @ w1 + b1  (once per M tile, kept in VMEM scratch)
#                       y = h @ w2 + b2  (per lane-dense N tile)
# Grid: (M tiles [parallel], N tiles [arbitrary, innermost]).
# ----------------------------------------------------------------------------
def _fused_vision_proj_kernel(x_ref, w1_ref, b1_ref, w2_ref, b2_ref, o_ref, h_ref):
    # First linear (stand-in ViT patch embedding): compute once per M tile.
    @pl.when(pl.program_id(1) == 0)
    def _():
        h = jnp.dot(x_ref[...], w1_ref[...], preferred_element_type=jnp.float32)
        h_ref[...] = (h + b1_ref[...]).astype(h_ref.dtype)   # bf16 scratch

    # Second linear (linear_proj) on the current lane-dense output tile.
    y = jnp.dot(h_ref[...], w2_ref[...], preferred_element_type=jnp.float32)
    o_ref[...] = (y + b2_ref[...]).astype(o_ref.dtype)


def fused_vision_projection(x, w1p, b1p, w2p, b2p, *, n_out, tm=128, tn=128):
    """x: [M, K1] f32 (unpadded activations).
       w1p: [K1p, H1p] bf16, b1p: [1, H1p] f32   (padded, pre-transposed)
       w2p: [H1p, N2p] bf16, b2p: [1, N2p] f32   (padded, pre-transposed)
       returns [M, n_out] f32."""
    M, K1 = x.shape
    K1p, H1p = w1p.shape
    H1p2, N2p = w2p.shape
    assert H1p == H1p2 and K1 <= K1p and n_out <= N2p
    assert K1p % 128 == 0 and H1p % 128 == 0 and N2p % 128 == 0

    # Tile sizes: cap by (padded) problem size; pad rows instead of asserting M % tm == 0.
    tm = min(tm, _round_up(M, 8))
    tn = min(_round_up(tn, 128), N2p)
    if N2p % tn != 0:
        tn = 128
    Mp = _round_up(M, tm)

    # Pad + cast activations once at the kernel boundary (bf16 operands, f32 accum).
    xp = jnp.pad(x.astype(jnp.bfloat16), ((0, Mp - M), (0, K1p - K1)))

    grid = (Mp // tm, N2p // tn)

    # Advisory cost estimate so XLA schedules surrounding ops around the custom call.
    flops = 2 * Mp * K1p * H1p + 2 * Mp * H1p * N2p
    bytes_accessed = (Mp * K1p * 2 + K1p * H1p * 2 + H1p * 4
                      + H1p * N2p * 2 + N2p * 4 + Mp * N2p * 4)

    # VMEM budget: double-buffered streamed tiles + resident w1/b1 + bf16 scratch.
    vmem_bytes = (2 * tm * K1p * 2                 # x tile (bf16, double-buffered)
                  + K1p * H1p * 2 + H1p * 4        # w1 + b1 (resident across grid)
                  + 2 * (H1p * tn * 2 + tn * 4)    # w2 / b2 tiles (double-buffered)
                  + 2 * tm * tn * 4                # output tile (double-buffered)
                  + tm * H1p * 2)                  # intermediate h scratch (bf16)
    vmem_limit = int(min(max(2 * vmem_bytes, 16 * 2**20), 40 * 2**20))

    out = pl.pallas_call(
        _fused_vision_proj_kernel,
        out_shape=jax.ShapeDtypeStruct((Mp, N2p), jnp.float32),
        grid_spec=pltpu.PrefetchScalarGridSpec(
            num_scalar_prefetch=0,
            grid=grid,
            in_specs=[
                pl.BlockSpec((tm, K1p), lambda m, n: (m, 0)),   # activation row tile
                pl.BlockSpec((K1p, H1p), lambda m, n: (0, 0)),  # w_patch (resident)
                pl.BlockSpec((1, H1p), lambda m, n: (0, 0)),    # b_patch (resident)
                pl.BlockSpec((H1p, tn), lambda m, n: (0, n)),   # w_proj tile (streamed)
                pl.BlockSpec((1, tn), lambda m, n: (0, n)),     # b_proj tile
            ],
            out_specs=pl.BlockSpec((tm, tn), lambda m, n: (m, n)),
            scratch_shapes=[pltpu.VMEM((tm, H1p), jnp.bfloat16)],
        ),
        compiler_params=pltpu.CompilerParams(
            dimension_semantics=("parallel", "arbitrary"),
            vmem_limit_bytes=vmem_limit,
        ),
        cost_estimate=pl.CostEstimate(
            flops=flops, transcendentals=0, bytes_accessed=bytes_accessed),
    )(xp, w1p, b1p, w2p, b2p)

    return out[:M, :n_out]


def _unfold_patches(images, patch):
    """NCHW [B,C,H,W] -> [B, S, C*P*P] row-major patch matrix (lane dim = C*P*P)."""
    # TODO(synk): for large images this unfold could be folded into the kernel's
    # DMA via an index_map over (B, H/P, W/P) blocks instead of a JAX transpose.
    B, C, H, W = images.shape
    P = patch
    x = images.reshape(B, C, H // P, P, W // P, P)
    x = jnp.transpose(x, (0, 2, 4, 1, 3, 5))
    return x.reshape(B, (H // P) * (W // P), C * P * P)


# ----------------------------------------------------------------------------
# MegatronVisionModel (JAX / Pallas)
# ----------------------------------------------------------------------------
class MegatronVisionModelPallas:
    def __init__(self, key, *, in_channels=3, patch=4, img=16,
                 eva_hidden=64, hidden=32, tile_m=128, tile_n=128):
        self.patch = patch
        self.hidden = hidden
        self.eva_hidden = eva_hidden
        self.image_seq_length = (img // patch) ** 2
        self.tile_m, self.tile_n = tile_m, tile_n

        k_pe, k_w, k_b = jax.random.split(key, 3)
        K1 = in_channels * patch * patch

        # TODO(synk): real Eva2ClipModel is a checkpoint-loaded transformer stack
        # (not reproducible in-script); stand-in = patch-embedding linear producing
        # the same Megatron [s, b, eva_hidden] activation the forward expects.
        self.w_patch = 0.02 * jax.random.normal(k_pe, (K1, eva_hidden), jnp.float32)
        self.b_patch = jnp.zeros((eva_hidden,), jnp.float32)

        # self.linear_proj = torch.nn.Linear(eva_hidden, hidden): y = x @ W.T + b
        bound = 1.0 / (eva_hidden ** 0.5)
        self.w_proj = jax.random.uniform(
            k_w, (hidden, eva_hidden), jnp.float32, -bound, bound)  # torch [out, in]
        self.b_proj = jax.random.uniform(
            k_b, (hidden,), jnp.float32, -bound, bound)

        # Kernel-ready params, built ONCE: pre-transposed to [in, out], zero-padded
        # to lane-dense multiples of 128, weights cast to bf16 (f32 accumulation
        # happens in-kernel), biases kept f32.
        K1p = _round_up(K1, 128)
        H1p = _round_up(eva_hidden, 128)
        N2p = _round_up(hidden, 128)
        self._w1p = jnp.zeros((K1p, H1p), jnp.bfloat16).at[:K1, :eva_hidden].set(
            self.w_patch.astype(jnp.bfloat16))
        self._b1p = jnp.zeros((1, H1p), jnp.float32).at[0, :eva_hidden].set(self.b_patch)
        self._w2p = jnp.zeros((H1p, N2p), jnp.bfloat16).at[:eva_hidden, :hidden].set(
            self.w_proj.T.astype(jnp.bfloat16))
        self._b2p = jnp.zeros((1, N2p), jnp.float32).at[0, :hidden].set(self.b_proj)

    def __call__(self, images):
        # TODO(synk): context-parallel (cp_size != 1) all_gather / calibration-index
        # reshuffle branch omitted — single-device (cp_size == 1) path is exact.
        x = _unfold_patches(images, self.patch)              # [B, S, C*P*P]
        B, S, K1 = x.shape
        # vit -> [s, b, h] followed by vit_output.transpose(0, 1) -> [b, s, h] cancel
        # in the cp_size == 1 path, so both linears run in one fused pallas_call with
        # the intermediate kept in VMEM (no HBM round-trip of the activation).
        out = fused_vision_projection(
            x.reshape(B * S, K1), self._w1p, self._b1p, self._w2p, self._b2p,
            n_out=self.hidden, tm=self.tile_m, tn=self.tile_n)
        return out.reshape(B, S, self.hidden)                # [b, s, hidden]


if __name__ == "__main__":
    key = jax.random.PRNGKey(0)
    k_params, k_img = jax.random.split(key)

    model = MegatronVisionModelPallas(k_params)
    images = jax.random.normal(k_img, (2, 3, 16, 16), jnp.float32)  # NCHW

    out = jax.block_until_ready(model(images))
    assert out.shape == (2, model.image_seq_length, 32), out.shape

    # Pure-JAX reference mirroring the module semantics and the kernel's
    # bf16-operand / f32-accumulation precision policy.
    def ref(images):
        B, C, H, W = images.shape
        P = model.patch
        x = images.reshape(B, C, H // P, P, W // P, P)
        x = jnp.transpose(x, (0, 2, 4, 1, 3, 5)).reshape(B, -1, C * P * P)
        h = jnp.dot(x.astype(jnp.bfloat16), model.w_patch.astype(jnp.bfloat16),
                    preferred_element_type=jnp.float32) + model.b_patch
        vit = jnp.transpose(h, (1, 0, 2))                    # Megatron [s, b, eva_hidden]
        y = jnp.dot(jnp.transpose(vit, (1, 0, 2)).astype(jnp.bfloat16),
                    model.w_proj.T.astype(jnp.bfloat16),
                    preferred_element_type=jnp.float32) + model.b_proj
        return y                                             # [b, s, hidden]

    ref_out = ref(images)
    assert jnp.allclose(out, ref_out, atol=1e-2, rtol=1e-2), \
        float(jnp.max(jnp.abs(out - ref_out)))

    print("KERNEL_OK")
</pallas_src>

<mosaic_0001>
module attributes {stable_mosaic.version = 11 : i64} {
  func.func @_fused_vision_proj_kernel(%arg0: i32, %arg1: i32, %arg2: memref<32x128xbf16, #tpu.memory_space<vmem>>, %arg3: memref<128x128xbf16, #tpu.memory_space<vmem>>, %arg4: memref<1x128xf32, #tpu.memory_space<vmem>>, %arg5: memref<128x128xbf16, #tpu.memory_space<vmem>>, %arg6: memref<1x128xf32, #tpu.memory_space<vmem>>, %arg7: memref<32x128xf32, #tpu.memory_space<vmem>>, %arg8: memref<32x128xbf16, #tpu.memory_space<vmem>>) attributes {dimension_semantics = [#tpu.dimension_semantics<parallel>, #tpu.dimension_semantics<arbitrary>], iteration_bounds = array<i64: 1, 1>, scalar_prefetch = 0 : i64, scratch_operands = 1 : i64, tpu.core_type = #tpu.core_type<tc>, window_params = [{transform_indices = @transform_0, window_bounds = array<i64: 32, 128>}, {pipeline_mode = #tpu.pipeline_mode<synchronous>, transform_indices = @transform_1, window_bounds = array<i64: 128, 128>}, {pipeline_mode = #tpu.pipeline_mode<synchronous>, transform_indices = @transform_2, window_bounds = array<i64: 1, 128>}, {transform_indices = @transform_3, window_bounds = array<i64: 128, 128>}, {transform_indices = @transform_4, window_bounds = array<i64: 1, 128>}, {transform_indices = @transform_5, window_bounds = array<i64: 32, 128>}]} {
    %c0_i32 = arith.constant 0 : i32
    %0 = arith.cmpi eq, %arg1, %c0_i32 : i32
    %1 = arith.extui %0 : i1 to i32
    %c0_i32_0 = arith.constant 0 : i32
    %2 = arith.cmpi ne, %1, %c0_i32_0 : i32
    scf.if %2 {
      %c0_8 = arith.constant 0 : index
      %c0_9 = arith.constant 0 : index
      %10 = vector.load %arg2[%c0_8, %c0_9] : memref<32x128xbf16, #tpu.memory_space<vmem>>, vector<32x128xbf16>
      %c0_10 = arith.constant 0 : index
      %c0_11 = arith.constant 0 : index
      %11 = vector.load %arg3[%c0_10, %c0_11] : memref<128x128xbf16, #tpu.memory_space<vmem>>, vector<128x128xbf16>
      %cst_12 = arith.constant dense<0.000000e+00> : vector<32x128xf32>
      %12 = tpu.matmul %10, %11, %cst_12 {dimension_numbers = #tpu.dot_dimension_numbers<[1], [0], [0], [1], [0, 0, 1, 1], [], []>} : vector<32x128xbf16>, vector<128x128xbf16>, vector<32x128xf32> -> vector<32x128xf32>
      %c0_13 = arith.constant 0 : index
      %c0_14 = arith.constant 0 : index
      %13 = vector.load %arg4[%c0_13, %c0_14] : memref<1x128xf32, #tpu.memory_space<vmem>>, vector<1x128xf32>
      %14 = vector.broadcast %13 : vector<1x128xf32> to vector<32x128xf32>
      %15 = arith.addf %12, %14 : vector<32x128xf32>
      %16 = arith.truncf %15 : vector<32x128xf32> to vector<32x128xbf16>
      %c0_15 = arith.constant 0 : index
      %c0_16 = arith.constant 0 : index
      %17 = vector.load %arg8[%c0_15, %c0_16] : memref<32x128xbf16, #tpu.memory_space<vmem>>, vector<32x128xbf16>
      tpu.vector_store %arg8[%c0_15, %c0_16], %16 {strides = array<i32>} : memref<32x128xbf16, #tpu.memory_space<vmem>>, vector<32x128xbf16>,
    } else {
    }
    %c0 = arith.constant 0 : index
    %c0_1 = arith.constant 0 : index
    %3 = vector.load %arg8[%c0, %c0_1] : memref<32x128xbf16, #tpu.memory_space<vmem>>, vector<32x128xbf16>
    %c0_2 = arith.constant 0 : index
    %c0_3 = arith.constant 0 : index
    %4 = vector.load %arg5[%c0_2, %c0_3] : memref<128x128xbf16, #tpu.memory_space<vmem>>, vector<128x128xbf16>
    %cst = arith.constant dense<0.000000e+00> : vector<32x128xf32>
    %5 = tpu.matmul %3, %4, %cst {dimension_numbers = #tpu.dot_dimension_numbers<[1], [0], [0], [1], [0, 0, 1, 1], [], []>} : vector<32x128xbf16>, vector<128x128xbf16>, vector<32x128xf32> -> vector<32x128xf32>
    %c0_4 = arith.constant 0 : index
    %c0_5 = arith.constant 0 : index
    %6 = vector.load %arg6[%c0_4, %c0_5] : memref<1x128xf32, #tpu.memory_space<vmem>>, vector<1x128xf32>
    %7 = vector.broadcast %6 : vector<1x128xf32> to vector<32x128xf32>
    %8 = arith.addf %5, %7 : vector<32x128xf32>
    %c0_6 = arith.constant 0 : index
    %c0_7 = arith.constant 0 : index
    %9 = vector.load %arg7[%c0_6, %c0_7] : memref<32x128xf32, #tpu.memory_space<vmem>>, vector<32x128xf32>
    tpu.vector_store %arg7[%c0_6, %c0_7], %8 {strides = array<i32>} : memref<32x128xf32, #tpu.memory_space<vmem>>, vector<32x128xf32>,
    return
  }
  func.func @transform_0(%arg0: i32, %arg1: i32) -> (i32, i32) {
    %c0_i32 = arith.constant 0 : i32
    %c0_i32_0 = arith.constant 0 : i32
    return %arg0, %c0_i32 : i32, i32
  }
  func.func @transform_1(%arg0: i32, %arg1: i32) -> (i32, i32) {
    %c0_i32 = arith.constant 0 : i32
    %c0_i32_0 = arith.constant 0 : i32
    %c0_i32_1 = arith.constant 0 : i32
    return %c0_i32, %c0_i32_0 : i32, i32
  }
  func.func @transform_2(%arg0: i32, %arg1: i32) -> (i32, i32) {
    %c0_i32 = arith.constant 0 : i32
    %c0_i32_0 = arith.constant 0 : i32
    %c0_i32_1 = arith.constant 0 : i32
    return %c0_i32, %c0_i32_0 : i32, i32
  }
  func.func @transform_3(%arg0: i32, %arg1: i32) -> (i32, i32) {
    %c0_i32 = arith.constant 0 : i32
    %c0_i32_0 = arith.constant 0 : i32
    return %c0_i32, %arg1 : i32, i32
  }
  func.func @transform_4(%arg0: i32, %arg1: i32) -> (i32, i32) {
    %c0_i32 = arith.constant 0 : i32
    %c0_i32_0 = arith.constant 0 : i32
    return %c0_i32, %arg1 : i32, i32
  }
  func.func @transform_5(%arg0: i32, %arg1: i32) -> (i32, i32) {
    %c0_i32 = arith.constant 0 : i32
    return %arg0, %arg1 : i32, i32
  }
}

</mosaic_0001>

<bundles_post_ra>
// kernel: tpu_custom_call.1
= control target key start
LH: loop header
LB: loop body
LE: loop exit
PB: predicated region body
PF: predicated region fallthrough
CT: control target
= control target key end

     0   :  { %10 = vsyncpa [#allocation4], 0  ;;  %s605_s0 = inlined_call_operand.hbm [shape: bf16[32,128], index: 0, kind: input, shape index: {}]   ;;  %s606_s1 = inlined_call_operand.hbm [shape: bf16[128,128], index: 1, kind: input, shape index: {}]   ;;  %s607_s2 = inlined_call_operand.vmem [shape: f32[1,128], index: 2, kind: input, shape index: {}]   ;;  %s608_s3 = inlined_call_operand.hbm [shape: bf16[128,128], index: 3, kind: input, shape index: {}]   ;;  %s609_s4 = inlined_call_operand.vmem [shape: f32[1,128], index: 4, kind: input, shape index: {}]   ;;  %s610_s5 = inlined_call_operand.hbm [shape: f32[32,128], index: 5, kind: output, shape index: {}]  }
   0x1   :  { %11 = vsyncpa [#allocation7], 0 }
   0x2   :  { %12 = vsyncpa [#allocation5], 0  ;;  %s30_s20 = sshll.u32 %s606_s1, 4  ;;  %s549_s21 = smov [#allocation6]   ;;  %s31_s20 = int_to_ptr.hbm [resolvable:$true] %s30_s20 }
   0x3   :  { %s32_s22 = sshll.u32 %s549_s21, 4  ;;  %s17_s25 = sshll.u32 %s605_s0, 4  ;;  %s33_s22 = int_to_ptr.vmem [resolvable:$true] %s32_s22  ;;  %s18_s25 = int_to_ptr.hbm [resolvable:$true] %s17_s25 }
   0x4   :  { %s550_s26 = smov 64   ;;  %s551_s27 = smov 4  }
   0x5   :  { %38 = dma.hbm_to_vmem [thread:$0]  %s31_s20, 1024, %s33_s22, [#allocation7], %s550_s26, %s550_s26, %s551_s27  }
   0x6   :  { %s552_s28 = smov [#allocation3]   ;;  %s45_s7 = sshll.u32 %s608_s3, 4  ;;  %s46_s7 = int_to_ptr.hbm [resolvable:$true] %s45_s7 }
   0x7   :  { %s19_s29 = sshll.u32 %s552_s28, 4  ;;  %s553_s1 = smov [#allocation8]   ;;  %s20_s29 = int_to_ptr.vmem [resolvable:$true] %s19_s29 }
   0x8   :  { %25 = dma.hbm_to_vmem [thread:$0]  %s18_s25, 256, %s20_s29, [#allocation4], %s550_s26, %s550_s26, %s551_s27  }
   0x9   :  { %s47_s8 = sshll.u32 %s553_s1, 4  ;;  %s48_s8 = int_to_ptr.vmem [resolvable:$true] %s47_s8 }
   0xa   :  { %53 = dma.hbm_to_vmem [thread:$0]  %s46_s7, 1024, %s48_s8, [#allocation7], %s550_s26, %s550_s26, %s551_s27  }
   0xb   :  { %543 = dma.done.wait [#allocation4], 256  }
   0xc   :  { %544 = vsyncadd [#allocation4], 4294967040 }
   0xd   :  { %545 = dma.done.wait [#allocation7], 2048  }
   0xe   :  { %546 = vsyncadd [#allocation7], 4294965248  ;;  %v399_v0 = vld [vmem:[#allocation6 + $0x38] sm:$0xff]  ;;  %v398_v1 = vld [vmem:[#allocation6 + $0x30] sm:$0xff]  ;;  %s296_s14 = sshll.u32 %s610_s5, 4  ;;  %s556_s15 = smov 8   ;;  %s297_s14 = int_to_ptr.hbm [resolvable:$true] %s296_s14 }
   0xf   :  { %156 = vmatpush.bf16.msra.mxu0 %v399_v0  ;;  %421 = vmatpush.bf16.msra.mxu2 %v399_v0  ;;  %v409_v2 = vld [vmem:[#allocation8 + $0x38] sm:$0xff]  ;;  %v408_v3 = vld [vmem:[#allocation8 + $0x30] sm:$0xff]  ;;  %v397_v4 = vld [vmem:[#allocation6 + $0x28] sm:$0xff] }
  0x10   :  { %267 = vmatpush.bf16.msra.mxu1 %v409_v2  ;;  %429 = vmatpush.bf16.msra.mxu3 %v409_v2  ;;  %v396_v5 = vld [vmem:[#allocation6 + $0x20] sm:$0xff]  ;;  %v395_v6 = vld [vmem:[#allocation6 + $0x18] sm:$0xff]  ;;  %v394_v7 = vld [vmem:[#allocation6 + $0x10] sm:$0xff] }
  0x11   :  { %v393_v8 = vld [vmem:[#allocation6 + $0x8] sm:$0xff]  ;;  %v392_v9 = vld [vmem:[#allocation6] sm:$0xff]  ;;  %v390_v10 = vld [vmem:[#allocation3] sm:$0xff] }
  0x12   :  { %v391_v11 = vld [vmem:[#allocation3 + $0x8] sm:$0xff]  ;;  %v407_v12 = vld [vmem:[#allocation8 + $0x28] sm:$0xff]  ;;  %v406_v13 = vld [vmem:[#allocation8 + $0x20] sm:$0xff] }
  0x13   :  { %157 = vmatpush.bf16.msra.mxu0 %v398_v1  ;;  %422 = vmatpush.bf16.msra.mxu2 %v398_v1  ;;  %v405_v14 = vld [vmem:[#allocation8 + $0x18] sm:$0xff]  ;;  %v404_v15 = vld [vmem:[#allocation8 + $0x10] sm:$0xff]  ;;  %v403_v16 = vld [vmem:[#allocation8 + $0x8] sm:$0xff] }
  0x14   :  { %268 = vmatpush.bf16.msra.mxu1 %v408_v3  ;;  %430 = vmatpush.bf16.msra.mxu3 %v408_v3  ;;  %v402_v17 = vld [vmem:[#allocation8] sm:$0xff] }
  0x15   :  { %v445_v19 = vld [vmem:[%s607_s2] ss:$0 sm:$0xff]  ;;  %s554_s2 = smov [#allocation9]  }
  0x16   :  { %v446_v31 = vld [vmem:[%s609_s4] ss:$0 sm:$0xff]  ;;  %s294_s11 = sshll.u32 %s554_s2, 4  ;;  %s555_s4 = smov 128   ;;  %s295_s11 = int_to_ptr.vmem [resolvable:$true] %s294_s11 }
  0x17   :  { %158 = vmatpush.bf16.msra.mxu0 %v397_v4  ;;  %423 = vmatpush.bf16.msra.mxu2 %v397_v4 }
  0x18   :  { %269 = vmatpush.bf16.msra.mxu1 %v407_v12  ;;  %431 = vmatpush.bf16.msra.mxu3 %v407_v12 }
  0x1b   :  { %159 = vmatpush.bf16.msra.mxu0 %v396_v5  ;;  %424 = vmatpush.bf16.msra.mxu2 %v396_v5 }
  0x1c   :  { %270 = vmatpush.bf16.msra.mxu1 %v406_v13  ;;  %432 = vmatpush.bf16.msra.mxu3 %v406_v13 }
  0x1f   :  { %160 = vmatpush.bf16.msra.mxu0 %v395_v6  ;;  %425 = vmatpush.bf16.msra.mxu2 %v395_v6 }
  0x20   :  { %271 = vmatpush.bf16.msra.mxu1 %v405_v14  ;;  %433 = vmatpush.bf16.msra.mxu3 %v405_v14 }
  0x23   :  { %161 = vmatpush.bf16.msra.mxu0 %v394_v7  ;;  %426 = vmatpush.bf16.msra.mxu2 %v394_v7 }
  0x24   :  { %272 = vmatpush.bf16.msra.mxu1 %v404_v15  ;;  %434 = vmatpush.bf16.msra.mxu3 %v404_v15 }
  0x27   :  { %162 = vmatpush.bf16.msra.mxu0 %v393_v8  ;;  %427 = vmatpush.bf16.msra.mxu2 %v393_v8 }
  0x28   :  { %273 = vmatpush.bf16.msra.mxu1 %v403_v16  ;;  %435 = vmatpush.bf16.msra.mxu3 %v403_v16 }
  0x2b   :  { %163 = vmatpush.bf16.msra.mxu0 %v392_v9  ;;  %428 = vmatpush.bf16.msra.mxu2 %v392_v9 }
  0x2c   :  { %274 = vmatpush.bf16.msra.mxu1 %v402_v17  ;;  %436 = vmatpush.bf16.msra.mxu3 %v402_v17 }
  0x2e   :  { %164 = vmatmul.bf16.vlgmr.msra.gmra.mxu0 %v390_v10  ;;  %169 = vmatmul.bf16.vlgmr.msra.gmra.mxu2 %v391_v11 }
  0xab   :  { %v165_v18 = vpop.f32.mrf.mxu0 }
  0xac   :  { %v166_v21 = vadd.f32 %v445_v19, %v165_v18 }
  0xb1   :  { %v170_v20 = vpop.f32.mrf.mxu2 }
  0xb2   :  { %v171_v26 = vadd.f32 %v445_v19, %v170_v20 }
  0xb3   :  { %v167_v22 = vpop.f32.mrf.mxu0 }
  0xb4   :  { %v168_v23 = vadd.f32 %v445_v19, %v167_v22 }
  0xb6   :  { %v413_v24 = vpack.c.bf16 %v168_v23, %v166_v21 }
  0xb8   :  { %414 = vst [vmem:[#allocation2] sm:$0xff] %v413_v24  }
  0xb9   :  { %v172_v25 = vpop.f32.mrf.mxu2 }
  0xba   :  { %v173_v27 = vadd.f32 %v445_v19, %v172_v25 }
  0xbc   :  { %v418_v28 = vpack.c.bf16 %v173_v27, %v171_v26 }
  0xbe   :  { %420 = vst [vmem:[#allocation2 + $0x8] sm:$0xff] %v418_v28  }
  0xbf   :  { %v400_v29 = vld [vmem:[#allocation2] sm:$0xff] }
  0xc0   :  { %275 = vmatmul.bf16.vlgmr.msra.gmra.mxu1 %v400_v29 }
  0xc5   :  { %v401_v30 = vld [vmem:[#allocation2 + $0x8] sm:$0xff] }
  0xc6   :  { %280 = vmatmul.bf16.vlgmr.msra.gmra.mxu3 %v401_v30 }
 0x13d   :  { %v276_v32 = vpop.f32.mrf.mxu1 }
 0x13e   :  { %v277_v33 = vadd.f32 %v446_v31, %v276_v32 }
 0x140   :  { %286 = vst [vmem:[#allocation9] sm:$0xff] %v277_v33 }
 0x145   :  { %v278_v34 = vpop.f32.mrf.mxu1 }
 0x146   :  { %v279_v35 = vadd.f32 %v446_v31, %v278_v34 }
 0x148   :  { %287 = vst [vmem:[#allocation9 + $0x8] sm:$0xff] %v279_v35 }
 0x149   :  { %v281_v36 = vpop.f32.mrf.mxu3 }
 0x14a   :  { %v282_v37 = vadd.f32 %v446_v31, %v281_v36 }
 0x14c   :  { %288 = vst [vmem:[#allocation9 + $0x10] sm:$0xff] %v282_v37 }
 0x151   :  { %v283_v38 = vpop.f32.mrf.mxu3 }
 0x152   :  { %v284_v39 = vadd.f32 %v446_v31, %v283_v38 }
 0x154   :  { %289 = vst [vmem:[#allocation9 + $0x18] sm:$0xff] %v284_v39 }
 0x155   :  { %302 = dma.vmem_to_hbm [thread:$0]  %s295_s11, 512, %s297_s14, [#allocation5], %s555_s4, %s555_s4, %s556_s15  }
 0x156   :  { %547 = dma.done.wait [#allocation5], 512  }
 0x157   :  { %548 = vsyncadd [#allocation5], 4294966784 }
 0x158   :  { %307 = vsyncpa [#allocation4], 1 }
 0x159   :  { %308 = vsyncpa [#allocation7], 1 }
 0x15a   :  { %309 = vsyncpa [#allocation5], 1 }

</bundles_post_ra>
